<compile_context>
chip_gen: v5e
topology: v5e:2x2
jax: 0.10.0
libtpu: 0.0.40
codegen_flags: <defaults>
</compile_context>

<pallas_src>
import jax
import jax.numpy as jnp
from jax.experimental import pallas as pl
from jax.experimental.pallas import tpu as pltpu


def _round_up(v, m):
    return ((v + m - 1) // m) * m


def _cdiv(a, b):
    return (a + b - 1) // b


def _dqn_kernel(x_ref, w1_ref, b1_ref, w2_ref, b2_ref, w3_ref, b3_ref,
                w4_ref, b4_ref, o_ref):
    # x_ref: (TILE_B, state_size) f32; weights bf16; biases f32; o_ref f32.
    x = x_ref[...].astype(jnp.bfloat16)            # in-kernel cast (VPU)
    h = jnp.dot(x, w1_ref[...], preferred_element_type=jnp.float32) + b1_ref[...]
    h = jnp.maximum(h, 0.0).astype(jnp.bfloat16)
    h = jnp.dot(h, w2_ref[...], preferred_element_type=jnp.float32) + b2_ref[...]
    h = jnp.maximum(h, 0.0).astype(jnp.bfloat16)
    h = jnp.dot(h, w3_ref[...], preferred_element_type=jnp.float32) + b3_ref[...]
    h = jnp.maximum(h, 0.0).astype(jnp.bfloat16)
    out = jnp.dot(h, w4_ref[...], preferred_element_type=jnp.float32) + b4_ref[...]
    o_ref[...] = out.astype(o_ref.dtype)           # unpadded [tile_b, action] store


def dqn_forward(x, params, *, max_tile_b=2048, min_grid=2):
    """x: [B, state_size] float32. params: dict of f32 weights/biases stored
    transposed as [in, out]. Returns [B, action_size] float32 Q-values."""
    B, state_size = x.shape
    action_size = params["w4"].shape[1]
    h3 = params["w3"].shape[1]
    h3_pad = _round_up(h3, 128)                    # lane-dense hidden-3 activations

    # Balanced batch tiles: enough tiles to cap the tile size, at least
    # `min_grid` so v7x's two TensorCores both get whole tiles; tiles are a
    # multiple of 8 (sublane) so padding stays tiny.
    num_tiles = max(min_grid, _cdiv(B, max_tile_b))
    tile_b = _round_up(_cdiv(B, num_tiles), 8)
    b_pad = num_tiles * tile_b
    x_p = jnp.pad(x, ((0, b_pad - B), (0, 0))) if b_pad != B else x

    # bf16 matmul operands; f32 biases. Hidden-3 width / layer-4 K padded to
    # 128 with zeros (exact: padded cols are relu(0+0)=0 and hit zero w4 rows).
    w1 = params["w1"].astype(jnp.bfloat16)
    w2 = params["w2"].astype(jnp.bfloat16)
    w3 = jnp.pad(params["w3"], ((0, 0), (0, h3_pad - h3))).astype(jnp.bfloat16)
    w4 = jnp.pad(params["w4"], ((0, h3_pad - h3), (0, 0))).astype(jnp.bfloat16)
    b1 = params["b1"].astype(jnp.float32)
    b2 = params["b2"].astype(jnp.float32)
    b3 = jnp.pad(params["b3"], ((0, 0), (0, h3_pad - h3))).astype(jnp.float32)
    b4 = params["b4"].astype(jnp.float32)

    def resident(arr):
        # Whole array as one block, same block index every grid step ->
        # stays VMEM-resident across the pipeline.
        return pl.BlockSpec(arr.shape, lambda i: (0, 0))

    out = pl.pallas_call(
        _dqn_kernel,
        out_shape=jax.ShapeDtypeStruct((b_pad, action_size), jnp.float32),
        grid=(num_tiles,),
        in_specs=[
            pl.BlockSpec((tile_b, state_size), lambda i: (i, 0)),   # x tile
            resident(w1), resident(b1),
            resident(w2), resident(b2),
            resident(w3), resident(b3),
            resident(w4), resident(b4),
        ],
        out_specs=pl.BlockSpec((tile_b, action_size), lambda i: (i, 0)),
        compiler_params=pltpu.CompilerParams(
            dimension_semantics=("parallel",),      # megacore split on v7x
            vmem_limit_bytes=32 * 1024 * 1024,      # covers larger x/out tiles
        ),
    )(x_p, w1, b1, w2, b2, w3, b3, w4, b4)

    return out[:B] if b_pad != B else out


def init_params(key, state_size, action_size):
    """Mirror the torch module: xavier_uniform weights, torch-Linear-default
    uniform(-1/sqrt(fan_in), 1/sqrt(fan_in)) biases. Stored as [in, out]."""
    dims = [(state_size, 128), (128, 128), (128, 64), (64, action_size)]
    params = {}
    for idx, (fan_in, fan_out) in enumerate(dims, start=1):
        key, kw, kb = jax.random.split(key, 3)
        limit = (6.0 / (fan_in + fan_out)) ** 0.5
        params[f"w{idx}"] = jax.random.uniform(
            kw, (fan_in, fan_out), jnp.float32, -limit, limit)
        b_limit = 1.0 / (fan_in ** 0.5)
        params[f"b{idx}"] = jax.random.uniform(
            kb, (1, fan_out), jnp.float32, -b_limit, b_limit)
    return params


if __name__ == "__main__":
    state_size = 16
    action_size = 4
    batch = 8

    key = jax.random.PRNGKey(0)
    key, kx = jax.random.split(key)
    x = jax.random.normal(kx, (batch, state_size), dtype=jnp.float32)
    params = init_params(key, state_size, action_size)

    out = dqn_forward(x, params)
    jax.block_until_ready(out)

    # Pure-JAX reference applying the same bf16 operand quantization
    # (f32 accumulation), matching the kernel's numerics.
    def ref(x, p):
        def q(a):
            return a.astype(jnp.bfloat16).astype(jnp.float32)
        h = jnp.maximum(q(x) @ q(p["w1"]) + p["b1"], 0.0)
        h = jnp.maximum(q(h) @ q(p["w2"]) + p["b2"], 0.0)
        h = jnp.maximum(q(h) @ q(p["w3"]) + p["b3"], 0.0)
        return q(h) @ q(p["w4"]) + p["b4"]

    expected = ref(x, params)
    assert out.shape == (batch, action_size)
    assert jnp.allclose(out, expected, atol=1e-3, rtol=1e-3)
    print("KERNEL_OK")
</pallas_src>

<mosaic_0001>
module attributes {stable_mosaic.version = 11 : i64} {
  func.func @_dqn_kernel(%arg0: i32, %arg1: memref<8x16xf32, #tpu.memory_space<vmem>>, %arg2: memref<16x128xbf16, #tpu.memory_space<vmem>>, %arg3: memref<1x128xf32, #tpu.memory_space<vmem>>, %arg4: memref<128x128xbf16, #tpu.memory_space<vmem>>, %arg5: memref<1x128xf32, #tpu.memory_space<vmem>>, %arg6: memref<128x128xbf16, #tpu.memory_space<vmem>>, %arg7: memref<1x128xf32, #tpu.memory_space<vmem>>, %arg8: memref<128x4xbf16, #tpu.memory_space<vmem>>, %arg9: memref<1x4xf32, #tpu.memory_space<vmem>>, %arg10: memref<8x4xf32, #tpu.memory_space<vmem>>) attributes {dimension_semantics = [#tpu.dimension_semantics<parallel>], iteration_bounds = array<i64: 2>, scalar_prefetch = 0 : i64, scratch_operands = 0 : i64, tpu.core_type = #tpu.core_type<tc>, window_params = [{transform_indices = @transform_0, window_bounds = array<i64: 8, 16>}, {pipeline_mode = #tpu.pipeline_mode<synchronous>, transform_indices = @transform_1, window_bounds = array<i64: 16, 128>}, {pipeline_mode = #tpu.pipeline_mode<synchronous>, transform_indices = @transform_2, window_bounds = array<i64: 1, 128>}, {pipeline_mode = #tpu.pipeline_mode<synchronous>, transform_indices = @transform_3, window_bounds = array<i64: 128, 128>}, {pipeline_mode = #tpu.pipeline_mode<synchronous>, transform_indices = @transform_4, window_bounds = array<i64: 1, 128>}, {pipeline_mode = #tpu.pipeline_mode<synchronous>, transform_indices = @transform_5, window_bounds = array<i64: 128, 128>}, {pipeline_mode = #tpu.pipeline_mode<synchronous>, transform_indices = @transform_6, window_bounds = array<i64: 1, 128>}, {pipeline_mode = #tpu.pipeline_mode<synchronous>, transform_indices = @transform_7, window_bounds = array<i64: 128, 4>}, {pipeline_mode = #tpu.pipeline_mode<synchronous>, transform_indices = @transform_8, window_bounds = array<i64: 1, 4>}, {transform_indices = @transform_9, window_bounds = array<i64: 8, 4>}]} {
    %c0 = arith.constant 0 : index
    %c0_0 = arith.constant 0 : index
    %0 = vector.load %arg1[%c0, %c0_0] : memref<8x16xf32, #tpu.memory_space<vmem>>, vector<8x16xf32>
    %1 = arith.truncf %0 : vector<8x16xf32> to vector<8x16xbf16>
    %c0_1 = arith.constant 0 : index
    %c0_2 = arith.constant 0 : index
    %2 = vector.load %arg2[%c0_1, %c0_2] : memref<16x128xbf16, #tpu.memory_space<vmem>>, vector<16x128xbf16>
    %cst = arith.constant dense<0.000000e+00> : vector<8x128xf32>
    %3 = tpu.matmul %1, %2, %cst {dimension_numbers = #tpu.dot_dimension_numbers<[1], [0], [0], [1], [0, 0, 1, 1], [], []>} : vector<8x16xbf16>, vector<16x128xbf16>, vector<8x128xf32> -> vector<8x128xf32>
    %c0_3 = arith.constant 0 : index
    %c0_4 = arith.constant 0 : index
    %4 = vector.load %arg3[%c0_3, %c0_4] : memref<1x128xf32, #tpu.memory_space<vmem>>, vector<1x128xf32>
    %5 = vector.broadcast %4 : vector<1x128xf32> to vector<8x128xf32>
    %6 = arith.addf %3, %5 : vector<8x128xf32>
    %cst_5 = arith.constant 0.000000e+00 : f32
    %7 = vector.broadcast %cst_5 : f32 to vector<8x128xf32>
    %8 = arith.maximumf %6, %7 : vector<8x128xf32>
    %9 = arith.truncf %8 : vector<8x128xf32> to vector<8x128xbf16>
    %c0_6 = arith.constant 0 : index
    %c0_7 = arith.constant 0 : index
    %10 = vector.load %arg4[%c0_6, %c0_7] : memref<128x128xbf16, #tpu.memory_space<vmem>>, vector<128x128xbf16>
    %cst_8 = arith.constant dense<0.000000e+00> : vector<8x128xf32>
    %11 = tpu.matmul %9, %10, %cst_8 {dimension_numbers = #tpu.dot_dimension_numbers<[1], [0], [0], [1], [0, 0, 1, 1], [], []>} : vector<8x128xbf16>, vector<128x128xbf16>, vector<8x128xf32> -> vector<8x128xf32>
    %c0_9 = arith.constant 0 : index
    %c0_10 = arith.constant 0 : index
    %12 = vector.load %arg5[%c0_9, %c0_10] : memref<1x128xf32, #tpu.memory_space<vmem>>, vector<1x128xf32>
    %13 = vector.broadcast %12 : vector<1x128xf32> to vector<8x128xf32>
    %14 = arith.addf %11, %13 : vector<8x128xf32>
    %cst_11 = arith.constant 0.000000e+00 : f32
    %15 = vector.broadcast %cst_11 : f32 to vector<8x128xf32>
    %16 = arith.maximumf %14, %15 : vector<8x128xf32>
    %17 = arith.truncf %16 : vector<8x128xf32> to vector<8x128xbf16>
    %c0_12 = arith.constant 0 : index
    %c0_13 = arith.constant 0 : index
    %18 = vector.load %arg6[%c0_12, %c0_13] : memref<128x128xbf16, #tpu.memory_space<vmem>>, vector<128x128xbf16>
    %cst_14 = arith.constant dense<0.000000e+00> : vector<8x128xf32>
    %19 = tpu.matmul %17, %18, %cst_14 {dimension_numbers = #tpu.dot_dimension_numbers<[1], [0], [0], [1], [0, 0, 1, 1], [], []>} : vector<8x128xbf16>, vector<128x128xbf16>, vector<8x128xf32> -> vector<8x128xf32>
    %c0_15 = arith.constant 0 : index
    %c0_16 = arith.constant 0 : index
    %20 = vector.load %arg7[%c0_15, %c0_16] : memref<1x128xf32, #tpu.memory_space<vmem>>, vector<1x128xf32>
    %21 = vector.broadcast %20 : vector<1x128xf32> to vector<8x128xf32>
    %22 = arith.addf %19, %21 : vector<8x128xf32>
    %cst_17 = arith.constant 0.000000e+00 : f32
    %23 = vector.broadcast %cst_17 : f32 to vector<8x128xf32>
    %24 = arith.maximumf %22, %23 : vector<8x128xf32>
    %25 = arith.truncf %24 : vector<8x128xf32> to vector<8x128xbf16>
    %c0_18 = arith.constant 0 : index
    %c0_19 = arith.constant 0 : index
    %26 = vector.load %arg8[%c0_18, %c0_19] : memref<128x4xbf16, #tpu.memory_space<vmem>>, vector<128x4xbf16>
    %cst_20 = arith.constant dense<0.000000e+00> : vector<8x4xf32>
    %27 = tpu.matmul %25, %26, %cst_20 {dimension_numbers = #tpu.dot_dimension_numbers<[1], [0], [0], [1], [0, 0, 1, 1], [], []>} : vector<8x128xbf16>, vector<128x4xbf16>, vector<8x4xf32> -> vector<8x4xf32>
    %c0_21 = arith.constant 0 : index
    %c0_22 = arith.constant 0 : index
    %28 = vector.load %arg9[%c0_21, %c0_22] : memref<1x4xf32, #tpu.memory_space<vmem>>, vector<1x4xf32>
    %29 = vector.broadcast %28 : vector<1x4xf32> to vector<8x4xf32>
    %30 = arith.addf %27, %29 : vector<8x4xf32>
    %c0_23 = arith.constant 0 : index
    %c0_24 = arith.constant 0 : index
    %31 = vector.load %arg10[%c0_23, %c0_24] : memref<8x4xf32, #tpu.memory_space<vmem>>, vector<8x4xf32>
    tpu.vector_store %arg10[%c0_23, %c0_24], %30 {strides = array<i32>} : memref<8x4xf32, #tpu.memory_space<vmem>>, vector<8x4xf32>,
    return
  }
  func.func @transform_0(%arg0: i32) -> (i32, i32) {
    %c0_i32 = arith.constant 0 : i32
    %c0_i32_0 = arith.constant 0 : i32
    return %arg0, %c0_i32 : i32, i32
  }
  func.func @transform_1(%arg0: i32) -> (i32, i32) {
    %c0_i32 = arith.constant 0 : i32
    %c0_i32_0 = arith.constant 0 : i32
    %c0_i32_1 = arith.constant 0 : i32
    return %c0_i32, %c0_i32_0 : i32, i32
  }
  func.func @transform_2(%arg0: i32) -> (i32, i32) {
    %c0_i32 = arith.constant 0 : i32
    %c0_i32_0 = arith.constant 0 : i32
    %c0_i32_1 = arith.constant 0 : i32
    return %c0_i32, %c0_i32_0 : i32, i32
  }
  func.func @transform_3(%arg0: i32) -> (i32, i32) {
    %c0_i32 = arith.constant 0 : i32
    %c0_i32_0 = arith.constant 0 : i32
    %c0_i32_1 = arith.constant 0 : i32
    return %c0_i32, %c0_i32_0 : i32, i32
  }
  func.func @transform_4(%arg0: i32) -> (i32, i32) {
    %c0_i32 = arith.constant 0 : i32
    %c0_i32_0 = arith.constant 0 : i32
    %c0_i32_1 = arith.constant 0 : i32
    return %c0_i32, %c0_i32_0 : i32, i32
  }
  func.func @transform_5(%arg0: i32) -> (i32, i32) {
    %c0_i32 = arith.constant 0 : i32
    %c0_i32_0 = arith.constant 0 : i32
    %c0_i32_1 = arith.constant 0 : i32
    return %c0_i32, %c0_i32_0 : i32, i32
  }
  func.func @transform_6(%arg0: i32) -> (i32, i32) {
    %c0_i32 = arith.constant 0 : i32
    %c0_i32_0 = arith.constant 0 : i32
    %c0_i32_1 = arith.constant 0 : i32
    return %c0_i32, %c0_i32_0 : i32, i32
  }
  func.func @transform_7(%arg0: i32) -> (i32, i32) {
    %c0_i32 = arith.constant 0 : i32
    %c0_i32_0 = arith.constant 0 : i32
    %c0_i32_1 = arith.constant 0 : i32
    return %c0_i32, %c0_i32_0 : i32, i32
  }
  func.func @transform_8(%arg0: i32) -> (i32, i32) {
    %c0_i32 = arith.constant 0 : i32
    %c0_i32_0 = arith.constant 0 : i32
    %c0_i32_1 = arith.constant 0 : i32
    return %c0_i32, %c0_i32_0 : i32, i32
  }
  func.func @transform_9(%arg0: i32) -> (i32, i32) {
    %c0_i32 = arith.constant 0 : i32
    %c0_i32_0 = arith.constant 0 : i32
    return %arg0, %c0_i32 : i32, i32
  }
}

</mosaic_0001>

<bundles_post_ra>
// kernel: tpu_custom_call.1
= control target key start
LH: loop header
LB: loop body
LE: loop exit
PB: predicated region body
PF: predicated region fallthrough
CT: control target
= control target key end

     0   :  { %14 = vsyncpa [#allocation3], 0  ;;  %s1309_s0 = inlined_call_operand.hbm [shape: f32[16,16], index: 0, kind: input, shape index: {}]   ;;  %s1310_s1 = inlined_call_operand.hbm [shape: bf16[16,128], index: 1, kind: input, shape index: {}]   ;;  %s1311_s2 = inlined_call_operand.vmem [shape: f32[1,128], index: 2, kind: input, shape index: {}]   ;;  %s1312_s3 = inlined_call_operand.vmem [shape: bf16[128,128], index: 3, kind: input, shape index: {}]   ;;  %s1313_s4 = inlined_call_operand.vmem [shape: f32[1,128], index: 4, kind: input, shape index: {}]   ;;  %s1314_s5 = inlined_call_operand.hbm [shape: bf16[128,128], index: 5, kind: input, shape index: {}]   ;;  %s1315_s6 = inlined_call_operand.vmem [shape: f32[1,128], index: 6, kind: input, shape index: {}]   ;;  %s1316_s7 = inlined_call_operand.vmem [shape: bf16[128,4], index: 7, kind: input, shape index: {}]   ;;  %s1317_s8 = inlined_call_operand.vmem [shape: f32[1,4], index: 8, kind: input, shape index: {}]   ;;  %s1318_s9 = inlined_call_operand.vmem [shape: f32[16,4], index: 9, kind: output, shape index: {}]  }
   0x1   :  { %16 = vsyncpa [#allocation3 + $0x1], 0 }
   0x2   :  { %17 = vsyncpa [#allocation5], 0  ;;  %s1140_s30 = smov 0   ;;  %s1142_s10 = smov 0  }
   0x3   :  { %s1144_s11 = smov 0   ;;  %s1146_s12 = smov 0  }
   0x4 LB: > { %s259_s15 = sshll.u32 %s1310_s1, 4  ;;  %s1164_s16 = sadd.s32 4294967295, %s1084_s12   ;;  %s1084_s12 = sphi %s1146_s12, %s1325_s12   ;;  %s1080_s11 = sphi %s1144_s11, %s1324_s11   ;;  %s1076_s10 = sphi %s1142_s10, %s1323_s10   ;;  %s1072_s30 = sphi %s1140_s30, %s1322_s30   ;;  %s260_s15 = int_to_ptr.hbm [resolvable:$true] %s259_s15 }
   0x5   : > { %p751_p0 = scmp.ge.s32.totalorder %s1084_s12, 1  ;;  %p44_p1 = scmp.eq.s32.totalorder %s1164_s16, 0 }
   0x6   : > { %p248_p2 = scmp.lt.s32.totalorder %s1084_s12, 3  ;;  %s1086_s18 = smov [#allocation4]  }
   0x7   : > { %s261_s19 = sshll.u32 %s1086_s18, 4  ;;  %s282_s22 = sshll.u32 %s1314_s5, 4  ;;  %s262_s19 = int_to_ptr.vmem [resolvable:$true] %s261_s19  ;;  %s283_s22 = int_to_ptr.hbm [resolvable:$true] %s282_s22 }
   0x8   : > { %p1169_p3 = pnand %p751_p0, %p248_p2  ;;  %s1087_s23 = smov [#allocation6]  }
   0x9   : > { %s284_s24 = sshll.u32 %s1087_s23, 4  ;;  %s1088_s25 = smov 64   ;;  %s285_s24 = int_to_ptr.vmem [resolvable:$true] %s284_s24 }
   0xa   : > { %p900_p4 = pneg %p1169_p3  ;;  %s1089_s26 = smov 4  }
   0xb   : > { %s1181_s27 = sadd.s32 1, %s1084_s12   ;;  %s30_s29 = sadd.s32 1, %s1080_s11 }
   0xc   : > { %p901_p5 = pnand %p900_p4, %p44_p1  ;;  %s27_s28 = ssub.s32 %s1084_s12, %s1181_s27 }
   0xd   : > { %p28_p6 = scmp.eq.s32.totalorder %s27_s28, 0  ;;  %p37_p7 = scmp.ne.s32.totalorder %s1080_s11, %s1076_s10 }
   0xe   : > { %903 = dma.hbm_to_vmem [thread:$0]  (!%p901_p5), %s260_s15, 128, %s262_s19, [#allocation5], %s1088_s25, %s1088_s25, %s1089_s26  }
   0xf   : > { %906 = dma.hbm_to_vmem [thread:$0]  (!%p901_p5), %s283_s22, 1024, %s285_s24, [#allocation5], %s1088_s25, %s1088_s25, %s1089_s26  }
  0x10   : > { %p38_p8 = scmp.eq.s32.totalorder %s1084_s12, 0  ;;  %p43_p9 = scmp.ne.s32.totalorder %s1076_s10, %s1072_s30 }
  0x11   : > { %s1192_s13 = scalar_select %p28_p6, %s1080_s11, %s30_s29  }
  0x12   : > { %p1196_p10 = por %p44_p1, %p43_p9  ;;  %p913_p11 = scmp.lt.s32.totalorder %s1084_s12, 2 }
  0x13   : > { %s307_s15 = sand.u32 1, %s1080_s11   ;;  %s756_s18 = sshll.u32 %s1084_s12, 3 }
  0x14   : > { %p39_p12 = por %p38_p8, %p37_p7  ;;  %s755_s19 = sshll.u32 %s307_s15, 3 }
  0x15   : > { %s315_s22 = scalar_lea.hbm %s1309_s0, %s756_s18  ;;  %s311_s24 = scalar_lea.vmem [#allocation2], %s755_s19 }
  0x16   : > { %s317_s23 = sshll.u32 %s315_s22, 4  ;;  %s319_s25 = sshll.u32 %s311_s24, 4  ;;  %s318_s23 = int_to_ptr.hbm [resolvable:$true] %s317_s23  ;;  %s320_s25 = int_to_ptr.vmem [resolvable:$true] %s319_s25 }
  0x17   : > { %p1206_p13 = pnand %p913_p11, %p39_p12  ;;  %s308_s26 = scalar_lea.sflag [#allocation3], %s307_s15 }
  0x18   : > { %s1016_s28 = sshra.s32 %s318_s23, 4  ;;  %s1023_s19 = scalar_lea.hbm %s1309_s0, 16  ;;  %s1017_s28 = int_to_ptr.hbm [resolvable:$true] %s1016_s28 }
  0x19   : > { %s1018_s12 = scalar_lea.hbm %s1017_s28, 8  ;;  %p1020_p2 = pneg %p1206_p13 }
  0x1a   : > { %p1019_p0 = scmp.ne.s32.totalorder %s1017_s28, %s1018_s12  ;;  %p1024_p6 = scmp.lt.s32.totalorder %s1017_s28, %s1309_s0 }
  0x1b   : > { %p1025_p7 = scmp.lt.s32.totalorder %s1023_s19, %s1018_s12 }
  0x1c   : > { %p1021_p4 = pnand %p1020_p2, %p1019_p0 }
  0x1d   : > { %p1026_p8 = por %p1025_p7, %p1024_p6 }
  0x1e   : > { %p1022_p5 = pneg %p1021_p4 }
  0x20   : > { %p1027_p9 = pnand %p1026_p8, %p1022_p5 }
  0x22   : > { %1030 = shalt.err (!%p1027_p9)
}
  0x23   : > { %910 = dma.hbm_to_vmem [thread:$0]  (!%p1206_p13), %s318_s23, 128, %s320_s25, %s308_s26  }
  0x24   : > { %328 = sbr.rel (%p1169_p3) target bundleno = 590 (0x24e), region = 56  ;;  %s330_s15 = sand.u32 (!%p1169_p3), 1, %s1076_s10  }
  0x25   : > { %s758_s22 = sshll.u32 (!%p1169_p3), %s330_s15, 3  ;;  %s331_s24 = scalar_lea.sflag (!%p1169_p3), [#allocation3], %s330_s15 }
  0x26   : > { %s334_s29 = scalar_lea.vmem (!%p1169_p3), [#allocation2], %s758_s22 }
  0x29   : > { %1063 = dma.done.wait (%p1196_p10), %s331_s24, 128  }
  0x2a   : > { %1065 = vsyncadd (%p1196_p10), %s331_s24, 4294967168 }
  0x2b   : > { %1067 = dma.done.wait (%p44_p1), [#allocation5], 1152  }
  0x2c   : > { %1069 = vsyncadd (%p44_p1), [#allocation5], 4294966144  ;;  %v865_v0 = vld [vmem:[#allocation4] sm:$0xff]  ;;  %v384_v1 = vld [vmem:[%s334_s29] sm:$0xff]  ;;  %vm398_vm0 = vcmask 130048   ;;  %p379_p1 = scmp.lt.s32.totalorder %s1164_s16, 1 }
  0x2d   : > { %v873_v2 = vld [vmem:[%s1312_s3 + $0x38] sm:$0xff]  ;;  %v385_v3 = vpack.c.bf16 %v384_v1, %v384_v1  ;;  %409 = vmatpush.bf16.msra.mxu0 %v865_v0  ;;  %v872_v4 = vld [vmem:[%s1312_s3 + $0x30] sm:$0xff]  ;;  %v871_v5 = vld [vmem:[%s1312_s3 + $0x28] sm:$0xff]  ;;  %vm664_vm1 = vcmask 31744  }
  0x2e   : > { %485 = vmatpush.bf16.msra.mxu1 %v873_v2  ;;  %v870_v6 = vld [vmem:[%s1312_s3 + $0x20] sm:$0xff]  ;;  %v869_v7 = vld [vmem:[%s1312_s3 + $0x18] sm:$0xff]  ;;  %v868_v8 = vld [vmem:[%s1312_s3 + $0x10] sm:$0xff]  ;;  %s1327_s16 = smov (!%p379_p1, %s1164_s16), 1 }
  0x2f   : > { %v867_v9 = vld [vmem:[%s1312_s3 + $0x8] sm:$0xff]  ;;  %v866_v10 = vld [vmem:[%s1312_s3] sm:$0xff]  ;;  %v881_v11 = vld [vmem:[#allocation6 + $0x38] sm:$0xff]  ;;  %s761_s28 = sshll.u32 %s1327_s16, 3 }
  0x30   : > { %766 = vmatmul.msk.bf16.vlgmr.msra.gmra.mxu0 %vm398_vm0, %v385_v3  ;;  %568 = vmatpush.bf16.msra.mxu2 %v881_v11  ;;  %v880_v12 = vld [vmem:[#allocation6 + $0x30] sm:$0xff]  ;;  %v879_v13 = vld [vmem:[#allocation6 + $0x28] sm:$0xff]  ;;  %v878_v14 = vld [vmem:[#allocation6 + $0x20] sm:$0xff]  ;;  %s382_s21 = scalar_lea.vmem %s1318_s9, %s761_s28 }
  0x31   : > { %v877_v15 = vld [vmem:[#allocation6 + $0x18] sm:$0xff]  ;;  %v876_v16 = vld [vmem:[#allocation6 + $0x10] sm:$0xff]  ;;  %v952_v17 = vld [vmem:[%s1311_s2] ss:$0 sm:$0xff] }
  0x32   : > { %486 = vmatpush.bf16.msra.mxu1 %v872_v4  ;;  %v875_v23 = vld [vmem:[#allocation6 + $0x8] sm:$0xff]  ;;  %v874_v24 = vld [vmem:[#allocation6] sm:$0xff]  ;;  %v888_v26 = vld [vmem:[%s1316_s7 + $0x30] sm:$0xff] }
  0x33   : > { %v889_v25 = vld [vmem:[%s1316_s7 + $0x38] sm:$0xff]  ;;  %v887_v27 = vld [vmem:[%s1316_s7 + $0x28] sm:$0xff]  ;;  %v886_v28 = vld [vmem:[%s1316_s7 + $0x20] sm:$0xff] }
  0x34   : > { %569 = vmatpush.bf16.msra.mxu2 %v880_v12  ;;  %651 = vmatpush.bf16.msra.mxu3 %v889_v25  ;;  %v885_v29 = vld [vmem:[%s1316_s7 + $0x18] sm:$0xff]  ;;  %v884_v30 = vld [vmem:[%s1316_s7 + $0x10] sm:$0xff]  ;;  %v953_v31 = vld [vmem:[%s1313_s4] ss:$0 sm:$0xff] }
  0x35   : > { %v883_v37 = vld [vmem:[%s1316_s7 + $0x8] sm:$0xff]  ;;  %v882_v38 = vld [vmem:[%s1316_s7] sm:$0xff] }
  0x36   : > { %487 = vmatpush.bf16.msra.mxu1 %v871_v5  ;;  %v954_v39 = vld [vmem:[%s1315_s6] ss:$0 sm:$0xff] }
  0x37   : > { %v955_v45 = vld [vmem:[%s1317_s8] ss:$0 sm:$0xff] }
  0x38   : > { %570 = vmatpush.bf16.msra.mxu2 %v879_v13  ;;  %652 = vmatpush.bf16.msra.mxu3 %v888_v26 }
  0x3a   : > { %488 = vmatpush.bf16.msra.mxu1 %v870_v6 }
  0x3c   : > { %571 = vmatpush.bf16.msra.mxu2 %v878_v14  ;;  %653 = vmatpush.bf16.msra.mxu3 %v887_v27 }
  0x3e   : > { %489 = vmatpush.bf16.msra.mxu1 %v869_v7 }
  0x40   : > { %572 = vmatpush.bf16.msra.mxu2 %v877_v15  ;;  %654 = vmatpush.bf16.msra.mxu3 %v886_v28 }
  0x42   : > { %490 = vmatpush.bf16.msra.mxu1 %v868_v8 }
  0x44   : > { %573 = vmatpush.bf16.msra.mxu2 %v876_v16  ;;  %655 = vmatpush.bf16.msra.mxu3 %v885_v29 }
  0x46   : > { %491 = vmatpush.bf16.msra.mxu1 %v867_v9 }
  0x48   : > { %574 = vmatpush.bf16.msra.mxu2 %v875_v23  ;;  %656 = vmatpush.bf16.msra.mxu3 %v884_v30 }
  0x4a   : > { %492 = vmatpush.bf16.msra.mxu1 %v866_v10 }
  0x4c   : > { %575 = vmatpush.bf16.msra.mxu2 %v874_v24  ;;  %657 = vmatpush.bf16.msra.mxu3 %v883_v37 }
  0x50   : > { %658 = vmatpush.bf16.msra.mxu3 %v882_v38 }
  0xad   : > { %v411_v18 = vpop.f32.mrf.mxu0 }
  0xae   : > { %v412_v19 = vadd.f32 %v952_v17, %v411_v18 }
  0xb0   : > { %v415_v20 = vmax.f32 %v412_v19, 0.0 }
  0xb2   : > { %v416_v21 = vpack.c.bf16 %v415_v20, %v415_v20 }
  0xb4   : > { %493 = vmatmul.bf16.vlgmr.msra.gmra.mxu1 %v416_v21 }
  0xb5   : > { %v413_v22 = vpop.f32.mrf.mxu0 }
 0x131   : > { %v494_v32 = vpop.f32.mrf.mxu1 }
 0x132   : > { %v495_v33 = vadd.f32 %v953_v31, %v494_v32 }
 0x134   : > { %v498_v34 = vmax.f32 %v495_v33, 0.0 }
 0x136   : > { %v499_v35 = vpack.c.bf16 %v498_v34, %v498_v34 }
 0x138   : > { %576 = vmatmul.bf16.vlgmr.msra.gmra.mxu2 %v499_v35 }
 0x139   : > { %v496_v36 = vpop.f32.mrf.mxu1 }
 0x1bb   : > { %v577_v40 = vpop.f32.mrf.mxu2 }
 0x1bc   : > { %v578_v41 = vadd.f32 %v954_v39, %v577_v40 }
 0x1be   : > { %v581_v42 = vmax.f32 %v578_v41, 0.0 }
 0x1c0   : > { %v582_v43 = vpack.c.bf16 %v581_v42, %v581_v42 }
 0x1c2   : > { %659 = vmatmul.bf16.vlgmr.msra.gmra.mxu3 %v582_v43 }
 0x1c3   : > { %v579_v44 = vpop.f32.mrf.mxu2 }
 0x245   : > { %v660_v46 = vpop.f32.mrf.mxu3 }
 0x246   : > { %v661_v47 = vadd.f32 %v955_v45, %v660_v46 }
 0x248   : > { %665 = vst.msk [vmem:[%s382_s21] sm:$0xff] %vm664_vm1, %v661_v47 }
 0x24d   : > { %v662_v48 = vpop.f32.mrf.mxu3 }
 0x24e PF: > { %p20_p3 = scmp.ge.s32.totalorder %s1181_s27, 4   ;;  %s1322_s30 = smov %s1076_s10 }
 0x24f   : > { %s1323_s10 = smov %s1080_s11  ;;  %s1324_s11 = smov %s1192_s13 }
 0x250   : > { %s1325_s12 = smov %s1181_s27  ;;  %22 = sbr.rel (!%p20_p3) target bundleno = 4 (0x4), region = 104 }
 0x255   :  { %685 = vsyncpa [#allocation3], 1 }
 0x256   :  { %687 = vsyncpa [#allocation3 + $0x1], 1 }
 0x257   :  { %688 = vsyncpa [#allocation5], 1 }

</bundles_post_ra>
